<compile_context>
chip_gen: v6e
topology: v6e:2x2x1
jax: 0.10.0
libtpu: 0.0.40
codegen_flags: <defaults>
</compile_context>

<pallas_src>
import functools
import math

import jax
import jax.numpy as jnp
from jax.experimental import pallas as pl
from jax.experimental.pallas import tpu as pltpu


# ----------------------------------------------------------------------------
# Pallas kernels
# ----------------------------------------------------------------------------

def _mm_kernel(a_ref, b_ref, s_ref, t_ref, o_ref, acc_ref, *, relu):
    k = pl.program_id(2)

    @pl.when(k == 0)
    def _():
        acc_ref[...] = jnp.zeros_like(acc_ref)

    acc_ref[...] += jnp.dot(a_ref[...], b_ref[...],
                            preferred_element_type=jnp.float32)

    @pl.when(k == pl.num_programs(2) - 1)
    def _():
        y = acc_ref[...] * s_ref[...] + t_ref[...]
        if relu:
            y = jnp.maximum(y, 0.0)
        o_ref[...] = y.astype(o_ref.dtype)


def _mm_kernel_res(a_ref, b_ref, s_ref, t_ref, r_ref, o_ref, acc_ref, *, relu):
    k = pl.program_id(2)

    @pl.when(k == 0)
    def _():
        acc_ref[...] = jnp.zeros_like(acc_ref)

    acc_ref[...] += jnp.dot(a_ref[...], b_ref[...],
                            preferred_element_type=jnp.float32)

    @pl.when(k == pl.num_programs(2) - 1)
    def _():
        y = (acc_ref[...] * s_ref[...] + t_ref[...]
             + r_ref[...].astype(jnp.float32))
        if relu:
            y = jnp.maximum(y, 0.0)
        o_ref[...] = y.astype(o_ref.dtype)


# ----------------------------------------------------------------------------
# Fused matmul wrapper
# ----------------------------------------------------------------------------

def _round_up(x, m):
    return ((x + m - 1) // m) * m


def _select_tiles(M, K, Nc):
    """Choose padded sizes and tile sizes (sublane/lane aware, no needless pad)."""
    # --- M (sublane) ---
    Mp = _round_up(M, 16)
    if Mp % 256 == 0:
        tm = 256
    elif Mp % 128 == 0:
        tm = 128
    elif Mp <= 512:
        tm = Mp                       # full-dim block for small / odd M
    else:
        Mp = _round_up(M, 128)
        tm = 128
    # --- K (reduction) ---
    if K % 128 == 0:
        Kp = K
        tk = 128
        for cand in range(1024, 127, -128):
            if K % cand == 0:
                tk = cand
                break
    elif K <= 2048:
        Kp, tk = K, K                 # single full-K block, no padding copies
    else:
        Kp = _round_up(K, 128)
        tk = 512 if Kp % 512 == 0 else (256 if Kp % 256 == 0 else 128)
    # --- N (lane) ---
    if Nc % 128 == 0:
        Np = Nc
        tn = 512 if Nc % 512 == 0 else (256 if Nc % 256 == 0 else 128)
    elif Nc <= 256:
        Np, tn = Nc, Nc               # full-dim lane block, masked stores
    else:
        Np = _round_up(Nc, 128)
        tn = 128
    # Keep both v7x TensorCores busy when the M grid has a single block.
    if Mp // tm == 1 and Nc % 256 == 0:
        tn = min(tn, 256)
    return Mp, Kp, Np, tm, tk, tn


def fused_matmul(a, b, scale, shift, residual=None, relu=False,
                 out_dtype=jnp.bfloat16):
    """out = [relu]((a @ b) * scale + shift [+ residual]).

    a/b are cast to bf16 (MXU-native); accumulation and the epilogue are f32.
    """
    M, K = a.shape
    Kb, Nc = b.shape
    assert K == Kb
    Mp, Kp, Np, tm, tk, tn = _select_tiles(M, K, Nc)

    a = a.astype(jnp.bfloat16)
    b = b.astype(jnp.bfloat16)
    if (Mp, Kp) != (M, K):
        a = jnp.pad(a, ((0, Mp - M), (0, Kp - K)))
    if (Kp, Np) != (K, Nc):
        b = jnp.pad(b, ((0, Kp - K), (0, Np - Nc)))
    s = scale.astype(jnp.float32).reshape(1, Nc)
    t = shift.astype(jnp.float32).reshape(1, Nc)
    if Np != Nc:
        s = jnp.pad(s, ((0, 0), (0, Np - Nc)))
        t = jnp.pad(t, ((0, 0), (0, Np - Nc)))

    in_specs = [
        pl.BlockSpec((tm, tk), lambda i, j, k: (i, k)),
        pl.BlockSpec((tk, tn), lambda i, j, k: (k, j)),
        pl.BlockSpec((1, tn), lambda i, j, k: (0, j)),
        pl.BlockSpec((1, tn), lambda i, j, k: (0, j)),
    ]
    args = [a, b, s, t]
    bytes_accessed = (int(a.size) * 2 + int(b.size) * 2
                      + int(s.size) * 4 + int(t.size) * 4
                      + Mp * Np * jnp.dtype(out_dtype).itemsize)
    if residual is not None:
        r = residual
        if (Mp, Np) != (M, Nc):
            r = jnp.pad(r, ((0, Mp - M), (0, Np - Nc)))
        in_specs.append(pl.BlockSpec((tm, tn), lambda i, j, k: (i, j)))
        args.append(r)
        bytes_accessed += int(r.size) * jnp.dtype(r.dtype).itemsize
        kernel = functools.partial(_mm_kernel_res, relu=relu)
    else:
        kernel = functools.partial(_mm_kernel, relu=relu)

    out = pl.pallas_call(
        kernel,
        out_shape=jax.ShapeDtypeStruct((Mp, Np), out_dtype),
        grid_spec=pltpu.PrefetchScalarGridSpec(
            num_scalar_prefetch=0,
            grid=(Mp // tm, Np // tn, Kp // tk),
            in_specs=in_specs,
            out_specs=pl.BlockSpec((tm, tn), lambda i, j, k: (i, j)),
            scratch_shapes=[pltpu.VMEM((tm, tn), jnp.float32)],
        ),
        compiler_params=pltpu.CompilerParams(
            dimension_semantics=("parallel", "parallel", "arbitrary"),
            vmem_limit_bytes=32 * 1024 * 1024),
        cost_estimate=pl.CostEstimate(
            flops=2 * M * K * Nc,
            transcendentals=0,
            bytes_accessed=int(bytes_accessed)),
    )(*args)
    if (Mp, Np) != (M, Nc):
        out = out[:M, :Nc]
    return out


# ----------------------------------------------------------------------------
# Conv / pool / transposed-conv wrappers
# ----------------------------------------------------------------------------

def _im2col(x, kh, kw, stride, pad):
    """x: (N,H,W,C) -> patches (N,Ho,Wo, kh*kw*C), patch index order (di,dj,c)."""
    if pad:
        x = jnp.pad(x, ((0, 0), (pad, pad), (pad, pad), (0, 0)))
    N, Hp, Wp, C = x.shape
    Ho = (Hp - kh) // stride + 1
    Wo = (Wp - kw) // stride + 1
    cols = []
    for di in range(kh):
        for dj in range(kw):
            cols.append(x[:, di:di + stride * (Ho - 1) + 1:stride,
                          dj:dj + stride * (Wo - 1) + 1:stride, :])
    if len(cols) == 1:
        return cols[0], Ho, Wo
    return jnp.concatenate(cols, axis=-1), Ho, Wo


def conv_bn_act(x, w, scale, shift, stride=1, pad=1, relu=True, residual=None,
                out_dtype=jnp.bfloat16):
    """Conv2d (no bias) + affine (folded BN / bias) + optional residual + relu."""
    kh, kw, cin, cout = w.shape
    cols, Ho, Wo = _im2col(x.astype(jnp.bfloat16), kh, kw, stride, pad)
    N = x.shape[0]
    a = cols.reshape(N * Ho * Wo, kh * kw * cin)
    res = residual.reshape(N * Ho * Wo, cout) if residual is not None else None
    y = fused_matmul(a, w.astype(jnp.bfloat16).reshape(kh * kw * cin, cout),
                     scale, shift, residual=res, relu=relu, out_dtype=out_dtype)
    return y.reshape(N, Ho, Wo, cout)


def maxpool2d(x, k, stride, pad):
    # Chained elementwise max over the k*k shifted strided views (VPU-trivial);
    # left to XLA so the k*k-stacked copy never hits HBM (per perf review).
    if pad:
        x = jnp.pad(x, ((0, 0), (pad, pad), (pad, pad), (0, 0)),
                    constant_values=-jnp.inf)
    N, Hp, Wp, C = x.shape
    Ho = (Hp - k) // stride + 1
    Wo = (Wp - k) // stride + 1
    out = None
    for di in range(k):
        for dj in range(k):
            v = x[:, di:di + stride * (Ho - 1) + 1:stride,
                  dj:dj + stride * (Wo - 1) + 1:stride, :]
            out = v if out is None else jnp.maximum(out, v)
    return out


def conv_transpose_2x2(x, w, b):
    """ConvTranspose2d(kernel=2, stride=2). w: (Cin, 2, 2, Cout), b: (Cout,)."""
    N, H, W, Cin = x.shape
    Cout = w.shape[-1]
    wm = w.reshape(Cin, 4 * Cout).astype(jnp.bfloat16)
    scale = jnp.ones((4 * Cout,), jnp.float32)
    shift = jnp.tile(b.astype(jnp.float32), 4)
    y = fused_matmul(x.reshape(N * H * W, Cin), wm, scale, shift, relu=False,
                     out_dtype=jnp.bfloat16)
    y = y.reshape(N, H, W, 2, 2, Cout)
    y = jnp.transpose(y, (0, 1, 3, 2, 4, 5)).reshape(N, 2 * H, 2 * W, Cout)
    return y


# ----------------------------------------------------------------------------
# Parameter construction (deterministic, synthetic)
# ----------------------------------------------------------------------------

class Rng:
    def __init__(self, seed):
        self._k = jax.random.PRNGKey(seed)

    def __call__(self):
        self._k, k = jax.random.split(self._k)
        return k


def _conv_w(rng, kh, kw, cin, cout):
    fan = kh * kw * cin
    return jax.random.normal(rng(), (kh, kw, cin, cout), jnp.float32) / math.sqrt(fan)


def _bn(rng, c):
    gamma = 1.0 + 0.1 * jax.random.normal(rng(), (c,), jnp.float32)
    beta = 0.1 * jax.random.normal(rng(), (c,), jnp.float32)
    mean = 0.1 * jax.random.normal(rng(), (c,), jnp.float32)
    var = 1.0 + 0.1 * jax.random.uniform(rng(), (c,), jnp.float32)
    scale = gamma * jax.lax.rsqrt(var + 1e-5)
    shift = beta - mean * scale
    return scale, shift


def _conv_bn(rng, kh, kw, cin, cout):
    s, t = _bn(rng, cout)
    return {"w": _conv_w(rng, kh, kw, cin, cout), "s": s, "t": t}


def _layer(rng, cin, cout, nblocks, stride):
    blocks = []
    for b in range(nblocks):
        s = stride if b == 0 else 1
        ci = cin if b == 0 else cout
        blk = {"c1": _conv_bn(rng, 3, 3, ci, cout),
               "c2": _conv_bn(rng, 3, 3, cout, cout)}
        if s != 1 or ci != cout:
            blk["down"] = _conv_bn(rng, 1, 1, ci, cout)
        blocks.append(blk)
    return blocks


def _up_params(rng, cin, cout):
    return {"w": jax.random.normal(rng(), (cin, 2, 2, cout), jnp.float32)
                 / math.sqrt(4 * cin),
            "b": 0.05 * jax.random.normal(rng(), (cout,), jnp.float32)}


def _decoder(rng, conv_in, conv_out, up_in=None, up_out=None):
    up_in = conv_in if up_in is None else up_in
    up_out = conv_out if up_out is None else up_out
    return {"up": _up_params(rng, up_in, up_out),
            "c1": _conv_bn(rng, 3, 3, conv_in, conv_out),
            "c2": _conv_bn(rng, 3, 3, conv_out, conv_out)}


def make_params(seed=0, num_classes=4):
    rng = Rng(seed)
    f = [64, 128, 256, 512]
    P = {
        "first": _conv_bn(rng, 7, 7, 3, f[0]),
        "enc1": _layer(rng, 64, 64, 3, 1),
        "enc2": _layer(rng, 64, 128, 4, 2),
        "enc3": _layer(rng, 128, 256, 6, 2),
        "enc4": _layer(rng, 256, 512, 3, 2),
        "bridge": _conv_bn(rng, 3, 3, f[3], f[3] * 2),
        "dec1": _decoder(rng, f[3] * 2, f[3]),
        "dec2": _decoder(rng, f[3], f[2]),
        "dec3": _decoder(rng, f[2], f[1]),
        "dec4": _decoder(rng, f[1], f[0]),
        "dec5": _decoder(rng, f[1], f[0], up_in=f[0], up_out=f[0]),
        "last_up": _up_params(rng, f[0], f[0]),
        "last_conv": {"w": _conv_w(rng, 3, 3, f[0], num_classes),
                      "b": 0.05 * jax.random.normal(rng(), (num_classes,),
                                                    jnp.float32)},
    }
    return P


# ----------------------------------------------------------------------------
# Model forward
# ----------------------------------------------------------------------------

def basic_block_fwd(p, x, stride):
    if "down" in p:
        identity = conv_bn_act(x, p["down"]["w"], p["down"]["s"], p["down"]["t"],
                               stride=stride, pad=0, relu=False)
    else:
        identity = x
    h = conv_bn_act(x, p["c1"]["w"], p["c1"]["s"], p["c1"]["t"],
                    stride=stride, pad=1, relu=True)
    # conv2 + bn2 + residual add + relu, all fused in the kernel epilogue
    return conv_bn_act(h, p["c2"]["w"], p["c2"]["s"], p["c2"]["t"],
                       stride=1, pad=1, relu=True, residual=identity)


def layer_fwd(blocks, x, stride):
    for b, blk in enumerate(blocks):
        x = basic_block_fwd(blk, x, stride if b == 0 else 1)
    return x


def decoder_fwd(p, x1, x2):
    x1 = conv_transpose_2x2(x1, p["up"]["w"], p["up"]["b"])
    x = jnp.concatenate([x1, x2.astype(jnp.bfloat16)], axis=-1)  # channel concat
    x = conv_bn_act(x, p["c1"]["w"], p["c1"]["s"], p["c1"]["t"], 1, 1, True)
    x = conv_bn_act(x, p["c2"]["w"], p["c2"]["s"], p["c2"]["t"], 1, 1, True)
    return x


def forward(P, x_nchw):
    x = jnp.transpose(x_nchw, (0, 2, 3, 1)).astype(jnp.bfloat16)  # -> NHWC bf16

    e1 = conv_bn_act(x, P["first"]["w"], P["first"]["s"], P["first"]["t"],
                     stride=2, pad=3, relu=True)                 # H/2, 64ch
    maxe1 = maxpool2d(e1, 3, 2, 1)                               # H/4
    e2 = layer_fwd(P["enc1"], maxe1, 1)                          # H/4, 64
    e3 = layer_fwd(P["enc2"], e2, 2)                             # H/8, 128
    e4 = layer_fwd(P["enc3"], e3, 2)                             # H/16, 256
    e5 = layer_fwd(P["enc4"], e4, 2)                             # H/32, 512

    c = conv_bn_act(e5, P["bridge"]["w"], P["bridge"]["s"], P["bridge"]["t"],
                    stride=1, pad=1, relu=True)                  # 1024
    c = maxpool2d(c, 2, 2, 0)                                    # H/64

    d1 = decoder_fwd(P["dec1"], c, e5)
    d2 = decoder_fwd(P["dec2"], d1, e4)
    d3 = decoder_fwd(P["dec3"], d2, e3)
    d4 = decoder_fwd(P["dec4"], d3, e2)
    d5 = decoder_fwd(P["dec5"], d4, e1)

    out = conv_transpose_2x2(d5, P["last_up"]["w"], P["last_up"]["b"])
    nclass = P["last_conv"]["b"].shape[0]
    out = conv_bn_act(out, P["last_conv"]["w"],
                      jnp.ones((nclass,), jnp.float32), P["last_conv"]["b"],
                      stride=1, pad=1, relu=False, out_dtype=jnp.float32)
    return jnp.transpose(out, (0, 3, 1, 2))                      # -> NCHW, f32


# ----------------------------------------------------------------------------
# Main
# ----------------------------------------------------------------------------

if __name__ == "__main__":
    # Quick numerical sanity check of the fused bf16-matmul kernel.
    k = jax.random.PRNGKey(0)
    ka, kb, ks, kt, kr = jax.random.split(k, 5)
    a = jax.random.normal(ka, (100, 70), jnp.float32)
    b = jax.random.normal(kb, (70, 50), jnp.float32)
    s = jax.random.normal(ks, (50,), jnp.float32)
    t = jax.random.normal(kt, (50,), jnp.float32)
    r = jax.random.normal(kr, (100, 50), jnp.float32)
    got = fused_matmul(a, b, s, t, residual=r, relu=True, out_dtype=jnp.float32)
    want = jnp.maximum(
        jnp.dot(a.astype(jnp.bfloat16), b.astype(jnp.bfloat16),
                preferred_element_type=jnp.float32) * s + t + r, 0.0)
    assert jnp.allclose(got, want, atol=2e-2, rtol=2e-2), "matmul kernel mismatch"

    # Full UnetResnet34 forward.  Input: (N=2, C=3, H=64, W=64) NCHW (PyTorch
    # convention; 64 is the smallest spatial size giving a >=1x1 bottleneck).
    params = make_params(seed=0, num_classes=4)
    x = jax.random.normal(jax.random.PRNGKey(0), (2, 3, 64, 64), jnp.float32)

    fwd = jax.jit(forward)
    out = fwd(params, x)
    out = jax.block_until_ready(out)
    assert out.shape == (2, 4, 64, 64), out.shape
    assert bool(jnp.all(jnp.isfinite(out)))
    print("KERNEL_OK")
</pallas_src>

<mosaic_0001>
module attributes {stable_mosaic.version = 11 : i64} {
  func.func @_mm_kernel_res(%arg0: i32, %arg1: i32, %arg2: i32, %arg3: memref<112x70xbf16, #tpu.memory_space<vmem>>, %arg4: memref<70x50xbf16, #tpu.memory_space<vmem>>, %arg5: memref<1x50xf32, #tpu.memory_space<vmem>>, %arg6: memref<1x50xf32, #tpu.memory_space<vmem>>, %arg7: memref<112x50xf32, #tpu.memory_space<vmem>>, %arg8: memref<112x50xf32, #tpu.memory_space<vmem>>, %arg9: memref<112x50xf32, #tpu.memory_space<vmem>>) attributes {dimension_semantics = [#tpu.dimension_semantics<parallel>, #tpu.dimension_semantics<parallel>, #tpu.dimension_semantics<arbitrary>], iteration_bounds = array<i64: 1, 1, 1>, scalar_prefetch = 0 : i64, scratch_operands = 1 : i64, tpu.core_type = #tpu.core_type<tc>, window_params = [{transform_indices = @transform_0, window_bounds = array<i64: 112, 70>}, {transform_indices = @transform_1, window_bounds = array<i64: 70, 50>}, {transform_indices = @transform_2, window_bounds = array<i64: 1, 50>}, {transform_indices = @transform_3, window_bounds = array<i64: 1, 50>}, {transform_indices = @transform_4, window_bounds = array<i64: 112, 50>}, {transform_indices = @transform_5, window_bounds = array<i64: 112, 50>}]} {
    %c0_i32 = arith.constant 0 : i32
    %0 = arith.cmpi eq, %arg2, %c0_i32 : i32
    %1 = arith.extui %0 : i1 to i32
    %c0_i32_0 = arith.constant 0 : i32
    %2 = arith.cmpi ne, %1, %c0_i32_0 : i32
    scf.if %2 {
      %cst_10 = arith.constant 0.000000e+00 : f32
      %12 = vector.broadcast %cst_10 : f32 to vector<112x50xf32>
      %c0_11 = arith.constant 0 : index
      %c0_12 = arith.constant 0 : index
      %13 = vector.load %arg9[%c0_11, %c0_12] : memref<112x50xf32, #tpu.memory_space<vmem>>, vector<112x50xf32>
      tpu.vector_store %arg9[%c0_11, %c0_12], %12 {strides = array<i32>} : memref<112x50xf32, #tpu.memory_space<vmem>>, vector<112x50xf32>,
    } else {
    }
    %c0 = arith.constant 0 : index
    %c0_1 = arith.constant 0 : index
    %3 = vector.load %arg9[%c0, %c0_1] : memref<112x50xf32, #tpu.memory_space<vmem>>, vector<112x50xf32>
    %c0_2 = arith.constant 0 : index
    %c0_3 = arith.constant 0 : index
    %4 = vector.load %arg3[%c0_2, %c0_3] : memref<112x70xbf16, #tpu.memory_space<vmem>>, vector<112x70xbf16>
    %c0_4 = arith.constant 0 : index
    %c0_5 = arith.constant 0 : index
    %5 = vector.load %arg4[%c0_4, %c0_5] : memref<70x50xbf16, #tpu.memory_space<vmem>>, vector<70x50xbf16>
    %cst = arith.constant dense<0.000000e+00> : vector<112x50xf32>
    %6 = tpu.matmul %4, %5, %cst {dimension_numbers = #tpu.dot_dimension_numbers<[1], [0], [0], [1], [0, 0, 1, 1], [], []>} : vector<112x70xbf16>, vector<70x50xbf16>, vector<112x50xf32> -> vector<112x50xf32>
    %7 = arith.addf %3, %6 : vector<112x50xf32>
    %c0_6 = arith.constant 0 : index
    %c0_7 = arith.constant 0 : index
    %8 = vector.load %arg9[%c0_6, %c0_7] : memref<112x50xf32, #tpu.memory_space<vmem>>, vector<112x50xf32>
    tpu.vector_store %arg9[%c0_6, %c0_7], %7 {strides = array<i32>} : memref<112x50xf32, #tpu.memory_space<vmem>>, vector<112x50xf32>,
    %c0_i32_8 = arith.constant 0 : i32
    %9 = arith.cmpi eq, %arg2, %c0_i32_8 : i32
    %10 = arith.extui %9 : i1 to i32
    %c0_i32_9 = arith.constant 0 : i32
    %11 = arith.cmpi ne, %10, %c0_i32_9 : i32
    scf.if %11 {
      %c0_10 = arith.constant 0 : index
      %c0_11 = arith.constant 0 : index
      %12 = vector.load %arg9[%c0_10, %c0_11] : memref<112x50xf32, #tpu.memory_space<vmem>>, vector<112x50xf32>
      %c0_12 = arith.constant 0 : index
      %c0_13 = arith.constant 0 : index
      %13 = vector.load %arg5[%c0_12, %c0_13] : memref<1x50xf32, #tpu.memory_space<vmem>>, vector<1x50xf32>
      %14 = vector.broadcast %13 : vector<1x50xf32> to vector<112x50xf32>
      %15 = arith.mulf %12, %14 : vector<112x50xf32>
      %c0_14 = arith.constant 0 : index
      %c0_15 = arith.constant 0 : index
      %16 = vector.load %arg6[%c0_14, %c0_15] : memref<1x50xf32, #tpu.memory_space<vmem>>, vector<1x50xf32>
      %17 = vector.broadcast %16 : vector<1x50xf32> to vector<112x50xf32>
      %18 = arith.addf %15, %17 : vector<112x50xf32>
      %c0_16 = arith.constant 0 : index
      %c0_17 = arith.constant 0 : index
      %19 = vector.load %arg7[%c0_16, %c0_17] : memref<112x50xf32, #tpu.memory_space<vmem>>, vector<112x50xf32>
      %20 = arith.addf %18, %19 : vector<112x50xf32>
      %cst_18 = arith.constant 0.000000e+00 : f32
      %21 = vector.broadcast %cst_18 : f32 to vector<112x50xf32>
      %22 = arith.maximumf %20, %21 : vector<112x50xf32>
      %c0_19 = arith.constant 0 : index
      %c0_20 = arith.constant 0 : index
      %23 = vector.load %arg8[%c0_19, %c0_20] : memref<112x50xf32, #tpu.memory_space<vmem>>, vector<112x50xf32>
      tpu.vector_store %arg8[%c0_19, %c0_20], %22 {strides = array<i32>} : memref<112x50xf32, #tpu.memory_space<vmem>>, vector<112x50xf32>,
    } else {
    }
    return
  }
  func.func @transform_0(%arg0: i32, %arg1: i32, %arg2: i32) -> (i32, i32) {
    %c0_i32 = arith.constant 0 : i32
    return %arg0, %arg2 : i32, i32
  }
  func.func @transform_1(%arg0: i32, %arg1: i32, %arg2: i32) -> (i32, i32) {
    %c0_i32 = arith.constant 0 : i32
    return %arg2, %arg1 : i32, i32
  }
  func.func @transform_2(%arg0: i32, %arg1: i32, %arg2: i32) -> (i32, i32) {
    %c0_i32 = arith.constant 0 : i32
    %c0_i32_0 = arith.constant 0 : i32
    return %c0_i32, %arg1 : i32, i32
  }
  func.func @transform_3(%arg0: i32, %arg1: i32, %arg2: i32) -> (i32, i32) {
    %c0_i32 = arith.constant 0 : i32
    %c0_i32_0 = arith.constant 0 : i32
    return %c0_i32, %arg1 : i32, i32
  }
  func.func @transform_4(%arg0: i32, %arg1: i32, %arg2: i32) -> (i32, i32) {
    %c0_i32 = arith.constant 0 : i32
    return %arg0, %arg1 : i32, i32
  }
  func.func @transform_5(%arg0: i32, %arg1: i32, %arg2: i32) -> (i32, i32) {
    %c0_i32 = arith.constant 0 : i32
    return %arg0, %arg1 : i32, i32
  }
}

</mosaic_0001>

<bundles_post_ra>
// kernel: tpu_custom_call.1
= control target key start
LH: loop header
LB: loop body
LE: loop exit
PB: predicated region body
PF: predicated region fallthrough
CT: control target
= control target key end

     0   :  { %vm161_vm0 = vcmask 1042432   ;;  %v497_v0 = vmov 0.0   ;;  %vm498_vm1 = vmmov 0   ;;  %vm25_vm2 = vcmask 408576   ;;  %s774_s1 = inlined_call_operand.vmem [shape: bf16[70,50], index: 1, kind: input, shape index: {}]   ;;  %s775_s0 = inlined_call_operand.vmem [shape: bf16[112,70], index: 0, kind: input, shape index: {}]   ;;  %s776_s2 = inlined_call_operand.vmem [shape: f32[1,50], index: 2, kind: input, shape index: {}]   ;;  %s777_s3 = inlined_call_operand.vmem [shape: f32[1,50], index: 3, kind: input, shape index: {}]   ;;  %s778_s4 = inlined_call_operand.vmem [shape: f32[112,50], index: 4, kind: input, shape index: {}]   ;;  %s779_s5 = inlined_call_operand.vmem [shape: f32[112,50], index: 5, kind: output, shape index: {}]  }
   0x1   :  { %435 = vmatprep.subr.bf16.mxu0 %v497_v0  ;;  %v485_v1 = vld [vmem:[%s774_s1 + $0x20] ss:$0 sps:$4 sm:$0x77]   ;;  %473 = vmatprep.subr.bf16.mxu1 %v497_v0  ;;  %v486_v3 = vld [vmem:[%s774_s1 + $0x18] sm:$0xff]   ;;  %26 = vst.msk [vmem:[#allocation2] sm:$0xff] %vm25_vm2, %v497_v0  ;;  %27 = vst.msk [vmem:[#allocation2 + $0x8] sm:$0xff] %vm25_vm2, %v497_v0 }
   0x2   :  { %445 = vmatprep.mubr.msk.bf16.mxu0 %vm498_vm1, %v497_v0  ;;  %461 = vmatprep.mubr.msk.bf16.mxu1 %vm498_vm1, %v497_v0  ;;  %v163_v2 = vsel %vm161_vm0, %v485_v1, 0  ;;  %28 = vst.msk [vmem:[#allocation2 + $0x10] sm:$0xff] %vm25_vm2, %v497_v0  ;;  %29 = vst.msk [vmem:[#allocation2 + $0x18] sm:$0xff] %vm25_vm2, %v497_v0  ;;  %v487_v4 = vld [vmem:[%s774_s1 + $0x10] sm:$0xff]   ;;  %v488_v5 = vld [vmem:[%s774_s1 + $0x8] sm:$0xff]   ;;  %vm139_vm3 = vcmask 572416  }
   0x3   :  { %436 = vmatpush3.bf16.msra.mxu0 %v163_v2  ;;  %478 = vmatpush3.bf16.msra.mxu1 %v163_v2  ;;  %30 = vst.msk [vmem:[#allocation2 + $0x20] sm:$0xff] %vm25_vm2, %v497_v0  ;;  %31 = vst.msk [vmem:[#allocation2 + $0x28] sm:$0xff] %vm25_vm2, %v497_v0  ;;  %v489_v6 = vld [vmem:[%s774_s1] sm:$0xff]   ;;  %v492_v9 = vld [vmem:[%s775_s0 + $0x8] sm:$0xff]  }
   0x4   :  { %437 = vmatprep.subr.bf16.mxu0 %v497_v0  ;;  %474 = vmatprep.subr.bf16.mxu1 %v497_v0  ;;  %32 = vst.msk [vmem:[#allocation2 + $0x30] sm:$0xff] %vm25_vm2, %v497_v0  ;;  %33 = vst.msk [vmem:[#allocation2 + $0x38] sm:$0xff] %vm25_vm2, %v497_v0  ;;  %v490_v7 = vld [vmem:[%s775_s0] sm:$0xff]   ;;  %v493_v10 = vld [vmem:[%s775_s0 + $0x28] sm:$0xff]  }
   0x5   :  { %34 = vst.msk [vmem:[#allocation2 + $0x40] sm:$0xff] %vm25_vm2, %v497_v0  ;;  %35 = vst.msk [vmem:[#allocation2 + $0x48] sm:$0xff] %vm25_vm2, %v497_v0  ;;  %v491_v8 = vld [vmem:[%s775_s0 + $0x20] sm:$0xff]   ;;  %v494_v11 = vld [vmem:[%s775_s0 + $0x10] sm:$0xff]  }
   0x6   :  { %36 = vst.msk [vmem:[#allocation2 + $0x50] sm:$0xff] %vm25_vm2, %v497_v0  ;;  %37 = vst.msk [vmem:[#allocation2 + $0x58] sm:$0xff] %vm25_vm2, %v497_v0  ;;  %v495_v12 = vld [vmem:[%s775_s0 + $0x30] sm:$0xff]   ;;  %v496_v13 = vld [vmem:[%s775_s0 + $0x18] sm:$0xff]  }
   0x7   :  { %38 = vst.msk [vmem:[#allocation2 + $0x60] sm:$0xff] %vm25_vm2, %v497_v0  ;;  %39 = vst.msk [vmem:[#allocation2 + $0x68] sm:$0xff] %vm25_vm2, %v497_v0  ;;  %438 = vmatpush3.bf16.msra.mxu0 %v486_v3  ;;  %479 = vmatpush3.bf16.msra.mxu1 %v486_v3  ;;  %v631_v32 = vld [vmem:[%s776_s2] ss:$0 sm:$0xff]  ;;  %v351_v1 = vld [vmem:[%s778_s4 + $0x48] sm:$0xff] }
   0x8   :  { %439 = vmatprep.subr.bf16.mxu0 %v497_v0  ;;  %475 = vmatprep.subr.bf16.mxu1 %v497_v0  ;;  %v40_v14 = vld [vmem:[#allocation2] sm:$0xff]  ;;  %v41_v21 = vld [vmem:[#allocation2 + $0x8] sm:$0xff] }
   0x9   :  { %v42_v29 = vld [vmem:[#allocation2 + $0x10] sm:$0xff]  ;;  %v636_v35 = vld [vmem:[%s777_s3] ss:$0 sm:$0xff]  ;;  %v43_v38 = vld [vmem:[#allocation2 + $0x18] sm:$0xff] }
   0xa   :  { %v342_v46 = vld [vmem:[%s778_s4] sm:$0xff] }
   0xb   :  { %440 = vmatpush3.bf16.msra.mxu0 %v487_v4  ;;  %480 = vmatpush3.bf16.msra.mxu1 %v487_v4  ;;  %v350_v47 = vld [vmem:[%s778_s4 + $0x40] sm:$0xff] }
   0xc   :  { %441 = vmatprep.subr.bf16.mxu0 %v497_v0  ;;  %476 = vmatprep.subr.bf16.mxu1 %v497_v0  ;;  %v48_v15 = vld [vmem:[#allocation2 + $0x40] sm:$0xff]  ;;  %v49_v23 = vld [vmem:[#allocation2 + $0x48] sm:$0xff] }
   0xd   :  { %v50_v31 = vld [vmem:[#allocation2 + $0x50] sm:$0xff]  ;;  %v51_v43 = vld [vmem:[#allocation2 + $0x58] sm:$0xff]  ;;  %v44_v62 = vld [vmem:[#allocation2 + $0x20] sm:$0xff] }
   0xe   :  { %v52_v63 = vld [vmem:[#allocation2 + $0x60] sm:$0xff] }
   0xf   :  { %442 = vmatpush3.bf16.msra.mxu0 %v488_v5  ;;  %481 = vmatpush3.bf16.msra.mxu1 %v488_v5 }
  0x10   :  { %443 = vmatprep.subr.bf16.mxu0 %v497_v0  ;;  %477 = vmatprep.subr.bf16.mxu1 %v497_v0 }
  0x13   :  { %444 = vmatpush3.bf16.msra.mxu0 %v489_v6  ;;  %482 = vmatpush3.bf16.msra.mxu1 %v489_v6 }
  0x16   :  { %446 = vmatmul.mubr.msk.bf16.vlgmr.msra.gmra.mxu0 %vm139_vm3, %v490_v7  ;;  %462 = vmatmul.mubr.msk.bf16.vlgmr.msra.gmra.mxu1 %vm139_vm3, %v491_v8 }
  0x17   :  { %449 = vmatprep.mubr.msk.bf16.mxu0 %vm498_vm1, %v497_v0  ;;  %465 = vmatprep.mubr.msk.bf16.mxu1 %vm498_vm1, %v497_v0 }
  0x1e   :  { %450 = vmatmul.mubr.msk.bf16.gmra.mxu0 %vm139_vm3, %v492_v9  ;;  %466 = vmatmul.mubr.msk.bf16.gmra.mxu1 %vm139_vm3, %v493_v10 }
  0x1f   :  { %453 = vmatprep.mubr.msk.bf16.mxu0 %vm498_vm1, %v497_v0  ;;  %469 = vmatprep.mubr.msk.bf16.mxu1 %vm498_vm1, %v497_v0 }
  0x26   :  { %454 = vmatmul.mubr.msk.bf16.gmra.mxu0 %vm139_vm3, %v494_v11  ;;  %470 = vmatmul.mubr.msk.bf16.gmra.mxu1 %vm139_vm3, %v495_v12 }
  0x27   :  { %457 = vmatprep.mubr.msk.bf16.mxu0 %vm498_vm1, %v497_v0  ;;  %v343_v0 = vld [vmem:[%s778_s4 + $0x8] sm:$0xff] }
  0x2e   :  { %458 = vmatmul.mubr.msk.bf16.gmra.mxu0 %vm139_vm3, %v496_v13 }
  0xd6   :  { %v199_v16 = vpop.f32.mrf.mxu0  ;;  %v231_v17 = vpop.f32.mrf.mxu1 }
  0xd7   :  { %v254_v18 = vadd.f32 %v199_v16, %v40_v14  ;;  %v262_v19 = vadd.f32 %v231_v17, %v48_v15 }
  0xd8   :  { %v447_v20 = vpop.f32.mrf.mxu0  ;;  %v463_v22 = vpop.f32.mrf.mxu1 }
  0xd9   :  { %269 = vst.msk [vmem:[#allocation2] sm:$0xff] %vm25_vm2, %v254_v18  ;;  %277 = vst.msk [vmem:[#allocation2 + $0x40] sm:$0xff] %vm25_vm2, %v262_v19  ;;  %v45_v18 = vld [vmem:[#allocation2 + $0x28] sm:$0xff]  ;;  %v344_v20 = vld [vmem:[%s778_s4 + $0x10] sm:$0xff] }
  0xda   :  { %v202_v24 = vpop.f32.mrf.mxu0  ;;  %v234_v25 = vpop.f32.mrf.mxu1  ;;  %v53_v19 = vld [vmem:[#allocation2 + $0x68] sm:$0xff] }
  0xdb   :  { %v255_v26 = vadd.f32 %v202_v24, %v41_v21  ;;  %v263_v27 = vadd.f32 %v234_v25, %v49_v23  ;;  %v352_v21 = vld [vmem:[%s778_s4 + $0x50] sm:$0xff] }
  0xdc   :  { %v448_v28 = vpop.f32.mrf.mxu0  ;;  %v464_v30 = vpop.f32.mrf.mxu1 }
  0xdd   :  { %270 = vst.msk [vmem:[#allocation2 + $0x8] sm:$0xff] %vm25_vm2, %v255_v26  ;;  %278 = vst.msk [vmem:[#allocation2 + $0x48] sm:$0xff] %vm25_vm2, %v263_v27 }
  0xde   :  { %v207_v33 = vpop.f32.mrf.mxu0  ;;  %v239_v34 = vpop.f32.mrf.mxu1 }
  0xdf   :  { %v256_v36 = vadd.f32 %v207_v33, %v42_v29  ;;  %v264_v37 = vadd.f32 %v239_v34, %v50_v31 }
  0xe0   :  { %v286_v39 = vld [vmem:[#allocation2] sm:$0xff]  ;;  %v451_v41 = vpop.f32.mrf.mxu0  ;;  %v467_v42 = vpop.f32.mrf.mxu1 }
  0xe1   :  { %v294_v40 = vld [vmem:[#allocation2 + $0x40] sm:$0xff]  ;;  %v307_v44 = vmul.f32 %v631_v32, %v286_v39  ;;  %271 = vst.msk [vmem:[#allocation2 + $0x10] sm:$0xff] %vm25_vm2, %v256_v36  ;;  %279 = vst.msk [vmem:[#allocation2 + $0x50] sm:$0xff] %vm25_vm2, %v264_v37  ;;  %v345_v41 = vld [vmem:[%s778_s4 + $0x18] sm:$0xff] }
  0xe2   :  { %v315_v45 = vmul.f32 %v631_v32, %v294_v40  ;;  %v210_v48 = vpop.f32.mrf.mxu0  ;;  %v242_v49 = vpop.f32.mrf.mxu1  ;;  %v46_v40 = vld [vmem:[#allocation2 + $0x30] sm:$0xff]  ;;  %v353_v42 = vld [vmem:[%s778_s4 + $0x58] sm:$0xff] }
  0xe3   :  { %v328_v50 = vadd.f32 %v636_v35, %v307_v44  ;;  %v257_v52 = vadd.f32 %v210_v48, %v43_v38  ;;  %v265_v53 = vadd.f32 %v242_v49, %v51_v43 }
  0xe4   :  { %v336_v51 = vadd.f32 %v636_v35, %v315_v45  ;;  %v287_v54 = vld [vmem:[#allocation2 + $0x8] sm:$0xff]  ;;  %v452_v56 = vpop.f32.mrf.mxu0  ;;  %v468_v57 = vpop.f32.mrf.mxu1 }
  0xe5   :  { %v295_v55 = vld [vmem:[#allocation2 + $0x48] sm:$0xff]  ;;  %v356_v58 = vadd.f32 %v342_v46, %v328_v50  ;;  %v308_v60 = vmul.f32 %v631_v32, %v287_v54  ;;  %272 = vst.msk [vmem:[#allocation2 + $0x18] sm:$0xff] %vm25_vm2, %v257_v52  ;;  %280 = vst.msk [vmem:[#allocation2 + $0x58] sm:$0xff] %vm25_vm2, %v265_v53  ;;  %v47_v50 = vld [vmem:[#allocation2 + $0x38] sm:$0xff] }
  0xe6   :  { %v364_v59 = vadd.f32 %v350_v47, %v336_v51  ;;  %v316_v61 = vmul.f32 %v631_v32, %v295_v55  ;;  %v215_v2 = vpop.f32.mrf.mxu0  ;;  %v247_v3 = vpop.f32.mrf.mxu1 }
  0xe7   :  { %v370_v4 = vmax.f32 %v356_v58, 0.0  ;;  %v329_v6 = vadd.f32 %v636_v35, %v308_v60  ;;  %v258_v10 = vadd.f32 %v215_v2, %v44_v62  ;;  %v266_v12 = vadd.f32 %v247_v3, %v52_v63  ;;  %v346_v60 = vld [vmem:[%s778_s4 + $0x20] sm:$0xff] }
  0xe8   :  { %v378_v5 = vmax.f32 %v364_v59, 0.0  ;;  %v337_v7 = vadd.f32 %v636_v35, %v316_v61  ;;  %v288_v8 = vld [vmem:[#allocation2 + $0x10] sm:$0xff]  ;;  %v455_v11 = vpop.f32.mrf.mxu0  ;;  %v471_v13 = vpop.f32.mrf.mxu1  ;;  %v354_v61 = vld [vmem:[%s778_s4 + $0x60] sm:$0xff] }
  0xe9   :  { %v296_v9 = vld [vmem:[#allocation2 + $0x50] sm:$0xff]  ;;  %384 = vst.msk [vmem:[%s779_s5] sm:$0xff] %vm25_vm2, %v370_v4  ;;  %v357_v14 = vadd.f32 %v343_v0, %v329_v6  ;;  %v309_v16 = vmul.f32 %v631_v32, %v288_v8  ;;  %273 = vst.msk [vmem:[#allocation2 + $0x20] sm:$0xff] %vm25_vm2, %v258_v10  ;;  %v347_v8 = vld [vmem:[%s778_s4 + $0x28] sm:$0xff] }
  0xea   :  { %392 = vst.msk [vmem:[%s779_s5 + $0x40] sm:$0xff] %vm25_vm2, %v378_v5  ;;  %v365_v15 = vadd.f32 %v351_v1, %v337_v7  ;;  %v317_v17 = vmul.f32 %v631_v32, %v296_v9  ;;  %281 = vst.msk [vmem:[#allocation2 + $0x60] sm:$0xff] %vm25_vm2, %v266_v12  ;;  %v218_v22 = vpop.f32.mrf.mxu0  ;;  %v250_v23 = vpop.f32.mrf.mxu1  ;;  %v355_v9 = vld [vmem:[%s778_s4 + $0x68] sm:$0xff] }
  0xeb   :  { %v371_v24 = vmax.f32 %v357_v14, 0.0  ;;  %v330_v26 = vadd.f32 %v636_v35, %v309_v16  ;;  %v259_v30 = vadd.f32 %v218_v22, %v45_v18  ;;  %v267_v33 = vadd.f32 %v250_v23, %v53_v19  ;;  %v348_v18 = vld [vmem:[%s778_s4 + $0x30] sm:$0xff] }
  0xec   :  { %v379_v25 = vmax.f32 %v365_v15, 0.0  ;;  %v338_v27 = vadd.f32 %v636_v35, %v317_v17  ;;  %v289_v28 = vld [vmem:[#allocation2 + $0x18] sm:$0xff]  ;;  %v456_v31 = vpop.f32.mrf.mxu0  ;;  %v472_v34 = vpop.f32.mrf.mxu1 }
  0xed   :  { %v297_v29 = vld [vmem:[#allocation2 + $0x58] sm:$0xff]  ;;  %385 = vst.msk [vmem:[%s779_s5 + $0x8] sm:$0xff] %vm25_vm2, %v371_v24  ;;  %v358_v36 = vadd.f32 %v344_v20, %v330_v26  ;;  %v310_v38 = vmul.f32 %v631_v32, %v289_v28  ;;  %274 = vst.msk [vmem:[#allocation2 + $0x28] sm:$0xff] %vm25_vm2, %v259_v30 }
  0xee   :  { %393 = vst.msk [vmem:[%s779_s5 + $0x48] sm:$0xff] %vm25_vm2, %v379_v25  ;;  %v366_v37 = vadd.f32 %v352_v21, %v338_v27  ;;  %v318_v39 = vmul.f32 %v631_v32, %v297_v29  ;;  %282 = vst.msk [vmem:[#allocation2 + $0x68] sm:$0xff] %vm25_vm2, %v267_v33  ;;  %v223_v43 = vpop.f32.mrf.mxu0  ;;  %v349_v25 = vld [vmem:[%s778_s4 + $0x38] sm:$0xff] }
  0xef   :  { %v372_v44 = vmax.f32 %v358_v36, 0.0  ;;  %v331_v46 = vadd.f32 %v636_v35, %v310_v38  ;;  %v260_v48 = vadd.f32 %v223_v43, %v46_v40 }
  0xf0   :  { %v380_v45 = vmax.f32 %v366_v37, 0.0  ;;  %v339_v47 = vadd.f32 %v636_v35, %v318_v39  ;;  %v459_v49 = vpop.f32.mrf.mxu0  ;;  %v290_v53 = vld [vmem:[#allocation2 + $0x20] sm:$0xff] }
  0xf1   :  { %386 = vst.msk [vmem:[%s779_s5 + $0x10] sm:$0xff] %vm25_vm2, %v372_v44  ;;  %v359_v51 = vadd.f32 %v345_v41, %v331_v46  ;;  %v298_v54 = vld [vmem:[#allocation2 + $0x60] sm:$0xff]  ;;  %v311_v55 = vmul.f32 %v631_v32, %v290_v53  ;;  %275 = vst.msk [vmem:[#allocation2 + $0x30] sm:$0xff] %vm25_vm2, %v260_v48 }
  0xf2   :  { %394 = vst.msk [vmem:[%s779_s5 + $0x50] sm:$0xff] %vm25_vm2, %v380_v45  ;;  %v367_v52 = vadd.f32 %v353_v42, %v339_v47  ;;  %v319_v56 = vmul.f32 %v631_v32, %v298_v54  ;;  %v226_v57 = vpop.f32.mrf.mxu0 }
  0xf3   :  { %v373_v58 = vmax.f32 %v359_v51, 0.0  ;;  %v261_v62 = vadd.f32 %v226_v57, %v47_v50  ;;  %v332_v63 = vadd.f32 %v636_v35, %v311_v55 }
  0xf4   :  { %v381_v59 = vmax.f32 %v367_v52, 0.0  ;;  %v340_v0 = vadd.f32 %v636_v35, %v319_v56  ;;  %v460_v1 = vpop.f32.mrf.mxu0  ;;  %v291_v2 = vld [vmem:[#allocation2 + $0x28] sm:$0xff] }
  0xf5   :  { %387 = vst.msk [vmem:[%s779_s5 + $0x18] sm:$0xff] %vm25_vm2, %v373_v58  ;;  %v299_v3 = vld [vmem:[#allocation2 + $0x68] sm:$0xff]  ;;  %276 = vst.msk [vmem:[#allocation2 + $0x38] sm:$0xff] %vm25_vm2, %v261_v62  ;;  %v360_v4 = vadd.f32 %v346_v60, %v332_v63  ;;  %v312_v6 = vmul.f32 %v631_v32, %v291_v2 }
  0xf6   :  { %395 = vst.msk [vmem:[%s779_s5 + $0x58] sm:$0xff] %vm25_vm2, %v381_v59  ;;  %v368_v5 = vadd.f32 %v354_v61, %v340_v0  ;;  %v320_v7 = vmul.f32 %v631_v32, %v299_v3 }
  0xf7   :  { %v374_v10 = vmax.f32 %v360_v4, 0.0  ;;  %v333_v12 = vadd.f32 %v636_v35, %v312_v6 }
  0xf8   :  { %v382_v11 = vmax.f32 %v368_v5, 0.0  ;;  %v341_v13 = vadd.f32 %v636_v35, %v320_v7  ;;  %v292_v14 = vld [vmem:[#allocation2 + $0x30] sm:$0xff] }
  0xf9   :  { %388 = vst.msk [vmem:[%s779_s5 + $0x20] sm:$0xff] %vm25_vm2, %v374_v10  ;;  %v361_v15 = vadd.f32 %v347_v8, %v333_v12  ;;  %v313_v17 = vmul.f32 %v631_v32, %v292_v14 }
  0xfa   :  { %396 = vst.msk [vmem:[%s779_s5 + $0x60] sm:$0xff] %vm25_vm2, %v382_v11  ;;  %v369_v16 = vadd.f32 %v355_v9, %v341_v13 }
  0xfb   :  { %v375_v19 = vmax.f32 %v361_v15, 0.0  ;;  %v334_v21 = vadd.f32 %v636_v35, %v313_v17 }
  0xfc   :  { %v383_v20 = vmax.f32 %v369_v16, 0.0  ;;  %v293_v22 = vld [vmem:[#allocation2 + $0x38] sm:$0xff] }
  0xfd   :  { %v314_v23 = vmul.f32 %v631_v32, %v293_v22  ;;  %389 = vst.msk [vmem:[%s779_s5 + $0x28] sm:$0xff] %vm25_vm2, %v375_v19  ;;  %v362_v24 = vadd.f32 %v348_v18, %v334_v21 }
  0xfe   :  { %397 = vst.msk [vmem:[%s779_s5 + $0x68] sm:$0xff] %vm25_vm2, %v383_v20 }
  0xff   :  { %v335_v26 = vadd.f32 %v636_v35, %v314_v23  ;;  %v376_v27 = vmax.f32 %v362_v24, 0.0 }
 0x101   :  { %v363_v28 = vadd.f32 %v349_v25, %v335_v26  ;;  %390 = vst.msk [vmem:[%s779_s5 + $0x30] sm:$0xff] %vm25_vm2, %v376_v27 }
 0x103   :  { %v377_v32 = vmax.f32 %v363_v28, 0.0 }
 0x105   :  { %391 = vst.msk [vmem:[%s779_s5 + $0x38] sm:$0xff] %vm25_vm2, %v377_v32 }

</bundles_post_ra>
